<compile_context>
chip_gen: v5e
topology: v5e:2x2
jax: 0.10.0
libtpu: 0.0.40
codegen_flags: <defaults>
</compile_context>

<pallas_src>
import jax
import jax.numpy as jnp
from jax.experimental import pallas as pl
from jax.experimental.pallas import tpu as pltpu

_LANE = 128
_SUBLANE = 8
_MAX_TB = 512  # batch tile; safe for v7x 64 MiB VMEM with double-buffering


def _round_up(n, m):
    return -(-n // m) * m


def _qnn_kernel(x_ref, w1_ref, b1_ref, w2_ref, b2_ref, w3_ref, b3_ref, o_ref):
    # fc1 + relu  (bf16 operands -> f32 accumulate on MXU; bias/ReLU in f32)
    h1 = jnp.dot(x_ref[...], w1_ref[...], preferred_element_type=jnp.float32)
    h1 = jnp.maximum(h1 + b1_ref[...], 0.0)
    # fc2 + relu
    h2 = jnp.dot(h1.astype(w2_ref.dtype), w2_ref[...],
                 preferred_element_type=jnp.float32)
    h2 = jnp.maximum(h2 + b2_ref[...], 0.0)
    # fc3 (output padded to a lane-dense 128-wide slab)
    out = jnp.dot(h2.astype(w3_ref.dtype), w3_ref[...],
                  preferred_element_type=jnp.float32)
    o_ref[...] = (out + b3_ref[...]).astype(o_ref.dtype)


@jax.jit
def qnn_forward(x, w1, b1, w2, b2, w3, b3):
    batch, state_size = x.shape
    hidden = w1.shape[1]
    action_size = w3.shape[1]

    kp = _round_up(max(state_size, 1), _LANE)     # padded K of first matmul
    np_ = _round_up(max(action_size, 1), _LANE)   # padded (lane-dense) output width
    if batch <= _MAX_TB:
        tb = _round_up(batch, _SUBLANE)
        bp = tb
    else:
        tb = _MAX_TB
        bp = _round_up(batch, tb)

    # bf16 dot operands, zero-padded to lane/sublane-friendly shapes.
    xp = jnp.zeros((bp, kp), jnp.bfloat16).at[:batch, :state_size].set(
        x.astype(jnp.bfloat16))
    w1p = jnp.zeros((kp, hidden), jnp.bfloat16).at[:state_size, :].set(
        w1.astype(jnp.bfloat16))
    w2p = w2.astype(jnp.bfloat16)
    w3p = jnp.zeros((hidden, np_), jnp.bfloat16).at[:, :action_size].set(
        w3.astype(jnp.bfloat16))
    # Biases stay f32 (added to the f32 accumulator inside the kernel).
    b1p = b1.reshape(1, hidden).astype(jnp.float32)
    b2p = b2.reshape(1, hidden).astype(jnp.float32)
    b3p = jnp.zeros((1, np_), jnp.float32).at[:, :action_size].set(
        b3.reshape(1, action_size).astype(jnp.float32))

    grid = (bp // tb,)
    resident = lambda shape: pl.BlockSpec(shape, lambda i: (0, 0))

    out_padded = pl.pallas_call(
        _qnn_kernel,
        out_shape=jax.ShapeDtypeStruct((bp, np_), jnp.float32),
        grid_spec=pltpu.PrefetchScalarGridSpec(
            num_scalar_prefetch=0,
            grid=grid,
            in_specs=[
                pl.BlockSpec((tb, kp), lambda i: (i, 0)),   # x: tiled over batch
                resident((kp, hidden)), resident((1, hidden)),   # fc1
                resident((hidden, hidden)), resident((1, hidden)),  # fc2
                resident((hidden, np_)), resident((1, np_)),     # fc3 (padded)
            ],
            out_specs=pl.BlockSpec((tb, np_), lambda i: (i, 0)),
        ),
        compiler_params=pltpu.CompilerParams(
            dimension_semantics=("parallel",)),
    )(xp, w1p, b1p, w2p, b2p, w3p, b3p)

    # Strip batch / output-width padding outside the kernel (cheap XLA slice).
    return out_padded[:batch, :action_size].astype(x.dtype)


def init_qnn_params(key, state_size, action_size, hidden=128, dtype=jnp.float32):
    """Deterministic init mimicking PyTorch nn.Linear (uniform +-1/sqrt(fan_in))."""
    def linear(key, fan_in, fan_out):
        kw, kb = jax.random.split(key)
        bound = 1.0 / jnp.sqrt(fan_in)
        # Stored as [in, out] so the kernel does x @ W.
        w = jax.random.uniform(kw, (fan_in, fan_out), dtype, -bound, bound)
        b = jax.random.uniform(kb, (1, fan_out), dtype, -bound, bound)
        return w, b

    k1, k2, k3 = jax.random.split(key, 3)
    w1, b1 = linear(k1, state_size, hidden)
    w2, b2 = linear(k2, hidden, hidden)
    w3, b3 = linear(k3, hidden, action_size)
    return w1, b1, w2, b2, w3, b3


def _reference(x, w1, b1, w2, b2, w3, b3):
    """Pure-JAX reference matching the kernel's bf16-operand / f32-accum math."""
    xb = x.astype(jnp.bfloat16)
    w1b, w2b, w3b = (w.astype(jnp.bfloat16) for w in (w1, w2, w3))
    h1 = jnp.maximum(
        jnp.dot(xb, w1b, preferred_element_type=jnp.float32) + b1, 0.0)
    h2 = jnp.maximum(
        jnp.dot(h1.astype(jnp.bfloat16), w2b,
                preferred_element_type=jnp.float32) + b2, 0.0)
    return jnp.dot(h2.astype(jnp.bfloat16), w3b,
                   preferred_element_type=jnp.float32) + b3


if __name__ == "__main__":
    key = jax.random.PRNGKey(0)
    k_params, k_x = jax.random.split(key)

    batch, state_size, action_size = 8, 8, 4
    params = init_qnn_params(k_params, state_size, action_size)
    x = jax.random.normal(k_x, (batch, state_size), jnp.float32)

    out = qnn_forward(x, *params)
    jax.block_until_ready(out)

    ref = _reference(x, *params)
    assert out.shape == (batch, action_size)
    assert jnp.allclose(out, ref, atol=1e-3, rtol=1e-3), (
        f"max abs err {jnp.max(jnp.abs(out - ref))}")

    print("KERNEL_OK")
</pallas_src>

<mosaic_0001>
module attributes {stable_mosaic.version = 11 : i64} {
  func.func @_qnn_kernel(%arg0: i32, %arg1: memref<8x128xbf16, #tpu.memory_space<vmem>>, %arg2: memref<128x128xbf16, #tpu.memory_space<vmem>>, %arg3: memref<1x128xf32, #tpu.memory_space<vmem>>, %arg4: memref<128x128xbf16, #tpu.memory_space<vmem>>, %arg5: memref<1x128xf32, #tpu.memory_space<vmem>>, %arg6: memref<128x128xbf16, #tpu.memory_space<vmem>>, %arg7: memref<1x128xf32, #tpu.memory_space<vmem>>, %arg8: memref<8x128xf32, #tpu.memory_space<vmem>>) attributes {dimension_semantics = [#tpu.dimension_semantics<parallel>], iteration_bounds = array<i64: 1>, scalar_prefetch = 0 : i64, scratch_operands = 0 : i64, tpu.core_type = #tpu.core_type<tc>, window_params = [{transform_indices = @transform_0, window_bounds = array<i64: 8, 128>}, {pipeline_mode = #tpu.pipeline_mode<synchronous>, transform_indices = @transform_1, window_bounds = array<i64: 128, 128>}, {pipeline_mode = #tpu.pipeline_mode<synchronous>, transform_indices = @transform_2, window_bounds = array<i64: 1, 128>}, {pipeline_mode = #tpu.pipeline_mode<synchronous>, transform_indices = @transform_3, window_bounds = array<i64: 128, 128>}, {pipeline_mode = #tpu.pipeline_mode<synchronous>, transform_indices = @transform_4, window_bounds = array<i64: 1, 128>}, {pipeline_mode = #tpu.pipeline_mode<synchronous>, transform_indices = @transform_5, window_bounds = array<i64: 128, 128>}, {pipeline_mode = #tpu.pipeline_mode<synchronous>, transform_indices = @transform_6, window_bounds = array<i64: 1, 128>}, {transform_indices = @transform_7, window_bounds = array<i64: 8, 128>}]} {
    %c0 = arith.constant 0 : index
    %c0_0 = arith.constant 0 : index
    %0 = vector.load %arg1[%c0, %c0_0] : memref<8x128xbf16, #tpu.memory_space<vmem>>, vector<8x128xbf16>
    %c0_1 = arith.constant 0 : index
    %c0_2 = arith.constant 0 : index
    %1 = vector.load %arg2[%c0_1, %c0_2] : memref<128x128xbf16, #tpu.memory_space<vmem>>, vector<128x128xbf16>
    %cst = arith.constant dense<0.000000e+00> : vector<8x128xf32>
    %2 = tpu.matmul %0, %1, %cst {dimension_numbers = #tpu.dot_dimension_numbers<[1], [0], [0], [1], [0, 0, 1, 1], [], []>} : vector<8x128xbf16>, vector<128x128xbf16>, vector<8x128xf32> -> vector<8x128xf32>
    %c0_3 = arith.constant 0 : index
    %c0_4 = arith.constant 0 : index
    %3 = vector.load %arg3[%c0_3, %c0_4] : memref<1x128xf32, #tpu.memory_space<vmem>>, vector<1x128xf32>
    %4 = vector.broadcast %3 : vector<1x128xf32> to vector<8x128xf32>
    %5 = arith.addf %2, %4 : vector<8x128xf32>
    %cst_5 = arith.constant 0.000000e+00 : f32
    %6 = vector.broadcast %cst_5 : f32 to vector<8x128xf32>
    %7 = arith.maximumf %5, %6 : vector<8x128xf32>
    %8 = arith.truncf %7 : vector<8x128xf32> to vector<8x128xbf16>
    %c0_6 = arith.constant 0 : index
    %c0_7 = arith.constant 0 : index
    %9 = vector.load %arg4[%c0_6, %c0_7] : memref<128x128xbf16, #tpu.memory_space<vmem>>, vector<128x128xbf16>
    %cst_8 = arith.constant dense<0.000000e+00> : vector<8x128xf32>
    %10 = tpu.matmul %8, %9, %cst_8 {dimension_numbers = #tpu.dot_dimension_numbers<[1], [0], [0], [1], [0, 0, 1, 1], [], []>} : vector<8x128xbf16>, vector<128x128xbf16>, vector<8x128xf32> -> vector<8x128xf32>
    %c0_9 = arith.constant 0 : index
    %c0_10 = arith.constant 0 : index
    %11 = vector.load %arg5[%c0_9, %c0_10] : memref<1x128xf32, #tpu.memory_space<vmem>>, vector<1x128xf32>
    %12 = vector.broadcast %11 : vector<1x128xf32> to vector<8x128xf32>
    %13 = arith.addf %10, %12 : vector<8x128xf32>
    %cst_11 = arith.constant 0.000000e+00 : f32
    %14 = vector.broadcast %cst_11 : f32 to vector<8x128xf32>
    %15 = arith.maximumf %13, %14 : vector<8x128xf32>
    %16 = arith.truncf %15 : vector<8x128xf32> to vector<8x128xbf16>
    %c0_12 = arith.constant 0 : index
    %c0_13 = arith.constant 0 : index
    %17 = vector.load %arg6[%c0_12, %c0_13] : memref<128x128xbf16, #tpu.memory_space<vmem>>, vector<128x128xbf16>
    %cst_14 = arith.constant dense<0.000000e+00> : vector<8x128xf32>
    %18 = tpu.matmul %16, %17, %cst_14 {dimension_numbers = #tpu.dot_dimension_numbers<[1], [0], [0], [1], [0, 0, 1, 1], [], []>} : vector<8x128xbf16>, vector<128x128xbf16>, vector<8x128xf32> -> vector<8x128xf32>
    %c0_15 = arith.constant 0 : index
    %c0_16 = arith.constant 0 : index
    %19 = vector.load %arg7[%c0_15, %c0_16] : memref<1x128xf32, #tpu.memory_space<vmem>>, vector<1x128xf32>
    %20 = vector.broadcast %19 : vector<1x128xf32> to vector<8x128xf32>
    %21 = arith.addf %18, %20 : vector<8x128xf32>
    %c0_17 = arith.constant 0 : index
    %c0_18 = arith.constant 0 : index
    %22 = vector.load %arg8[%c0_17, %c0_18] : memref<8x128xf32, #tpu.memory_space<vmem>>, vector<8x128xf32>
    tpu.vector_store %arg8[%c0_17, %c0_18], %21 {strides = array<i32>} : memref<8x128xf32, #tpu.memory_space<vmem>>, vector<8x128xf32>,
    return
  }
  func.func @transform_0(%arg0: i32) -> (i32, i32) {
    %c0_i32 = arith.constant 0 : i32
    %c0_i32_0 = arith.constant 0 : i32
    return %arg0, %c0_i32 : i32, i32
  }
  func.func @transform_1(%arg0: i32) -> (i32, i32) {
    %c0_i32 = arith.constant 0 : i32
    %c0_i32_0 = arith.constant 0 : i32
    %c0_i32_1 = arith.constant 0 : i32
    return %c0_i32, %c0_i32_0 : i32, i32
  }
  func.func @transform_2(%arg0: i32) -> (i32, i32) {
    %c0_i32 = arith.constant 0 : i32
    %c0_i32_0 = arith.constant 0 : i32
    %c0_i32_1 = arith.constant 0 : i32
    return %c0_i32, %c0_i32_0 : i32, i32
  }
  func.func @transform_3(%arg0: i32) -> (i32, i32) {
    %c0_i32 = arith.constant 0 : i32
    %c0_i32_0 = arith.constant 0 : i32
    %c0_i32_1 = arith.constant 0 : i32
    return %c0_i32, %c0_i32_0 : i32, i32
  }
  func.func @transform_4(%arg0: i32) -> (i32, i32) {
    %c0_i32 = arith.constant 0 : i32
    %c0_i32_0 = arith.constant 0 : i32
    %c0_i32_1 = arith.constant 0 : i32
    return %c0_i32, %c0_i32_0 : i32, i32
  }
  func.func @transform_5(%arg0: i32) -> (i32, i32) {
    %c0_i32 = arith.constant 0 : i32
    %c0_i32_0 = arith.constant 0 : i32
    %c0_i32_1 = arith.constant 0 : i32
    return %c0_i32, %c0_i32_0 : i32, i32
  }
  func.func @transform_6(%arg0: i32) -> (i32, i32) {
    %c0_i32 = arith.constant 0 : i32
    %c0_i32_0 = arith.constant 0 : i32
    %c0_i32_1 = arith.constant 0 : i32
    return %c0_i32, %c0_i32_0 : i32, i32
  }
  func.func @transform_7(%arg0: i32) -> (i32, i32) {
    %c0_i32 = arith.constant 0 : i32
    %c0_i32_0 = arith.constant 0 : i32
    return %arg0, %c0_i32 : i32, i32
  }
}

</mosaic_0001>

<bundles_post_ra>
// kernel: qnn_forward.1
= control target key start
LH: loop header
LB: loop body
LE: loop exit
PB: predicated region body
PF: predicated region fallthrough
CT: control target
= control target key end

     0   :  { %s529_s1 = inlined_call_operand.vmem [shape: bf16[128,128], index: 1, kind: input, shape index: {}]   ;;  %s530_s3 = inlined_call_operand.vmem [shape: bf16[128,128], index: 3, kind: input, shape index: {}]   ;;  %s531_s2 = inlined_call_operand.vmem [shape: f32[1,128], index: 2, kind: input, shape index: {}]   ;;  %s532_s0 = inlined_call_operand.vmem [shape: bf16[8,128], index: 0, kind: input, shape index: {}]   ;;  %s533_s4 = inlined_call_operand.vmem [shape: f32[1,128], index: 4, kind: input, shape index: {}]   ;;  %s534_s5 = inlined_call_operand.vmem [shape: bf16[128,128], index: 5, kind: input, shape index: {}]   ;;  %s535_s6 = inlined_call_operand.vmem [shape: f32[1,128], index: 6, kind: input, shape index: {}]   ;;  %s536_s7 = inlined_call_operand.vmem [shape: f32[8,128], index: 7, kind: output, shape index: {}]  }
   0x1   :  { %v382_v0 = vld [vmem:[%s529_s1 + $0x38] sm:$0xff]  ;;  %v381_v1 = vld [vmem:[%s529_s1 + $0x30] sm:$0xff]  ;;  %v380_v4 = vld [vmem:[%s529_s1 + $0x28] sm:$0xff] }
   0x2   :  { %95 = vmatpush.bf16.msra.mxu0 %v382_v0  ;;  %v390_v2 = vld [vmem:[%s530_s3 + $0x38] sm:$0xff]  ;;  %v389_v3 = vld [vmem:[%s530_s3 + $0x30] sm:$0xff]  ;;  %v388_v5 = vld [vmem:[%s530_s3 + $0x28] sm:$0xff] }
   0x3   :  { %178 = vmatpush.bf16.msra.mxu1 %v390_v2  ;;  %v379_v6 = vld [vmem:[%s529_s1 + $0x20] sm:$0xff]  ;;  %v378_v8 = vld [vmem:[%s529_s1 + $0x18] sm:$0xff]  ;;  %v377_v10 = vld [vmem:[%s529_s1 + $0x10] sm:$0xff] }
   0x4   :  { %v387_v7 = vld [vmem:[%s530_s3 + $0x20] sm:$0xff]  ;;  %v386_v9 = vld [vmem:[%s530_s3 + $0x18] sm:$0xff]  ;;  %v385_v11 = vld [vmem:[%s530_s3 + $0x10] sm:$0xff] }
   0x5   :  { %v376_v12 = vld [vmem:[%s529_s1 + $0x8] sm:$0xff]  ;;  %v375_v13 = vld [vmem:[%s529_s1] sm:$0xff]  ;;  %v398_v17 = vld [vmem:[%s534_s5 + $0x38] sm:$0xff] }
   0x6   :  { %96 = vmatpush.bf16.msra.mxu0 %v381_v1  ;;  %v26_v14 = vld [vmem:[%s532_s0] sm:$0xf]  ;;  %v384_v15 = vld [vmem:[%s530_s3 + $0x8] sm:$0xff]  ;;  %261 = vmatpush.bf16.msra.mxu2 %v398_v17  ;;  %v397_v18 = vld [vmem:[%s534_s5 + $0x30] sm:$0xff] }
   0x7   :  { %179 = vmatpush.bf16.msra.mxu1 %v389_v3  ;;  %v383_v16 = vld [vmem:[%s530_s3] sm:$0xff]  ;;  %v396_v19 = vld [vmem:[%s534_s5 + $0x28] sm:$0xff]  ;;  %v394_v21 = vld [vmem:[%s534_s5 + $0x18] sm:$0xff] }
   0x8   :  { %v395_v20 = vld [vmem:[%s534_s5 + $0x20] sm:$0xff]  ;;  %v393_v22 = vld [vmem:[%s534_s5 + $0x10] sm:$0xff]  ;;  %v392_v29 = vld [vmem:[%s534_s5 + $0x8] sm:$0xff] }
   0x9   :  { %v399_v23 = vld [vmem:[%s531_s2] ss:$0 sm:$0xff] }
   0xa   :  { %97 = vmatpush.bf16.msra.mxu0 %v380_v4  ;;  %262 = vmatpush.bf16.msra.mxu2 %v397_v18  ;;  %v391_v30 = vld [vmem:[%s534_s5] sm:$0xff] }
   0xb   :  { %180 = vmatpush.bf16.msra.mxu1 %v388_v5  ;;  %v400_v31 = vld [vmem:[%s533_s4] ss:$0 sm:$0xff] }
   0xc   :  { %v401_v37 = vld [vmem:[%s535_s6] ss:$0 sm:$0xff] }
   0xe   :  { %98 = vmatpush.bf16.msra.mxu0 %v379_v6  ;;  %263 = vmatpush.bf16.msra.mxu2 %v396_v19 }
   0xf   :  { %181 = vmatpush.bf16.msra.mxu1 %v387_v7 }
  0x12   :  { %99 = vmatpush.bf16.msra.mxu0 %v378_v8  ;;  %264 = vmatpush.bf16.msra.mxu2 %v395_v20 }
  0x13   :  { %182 = vmatpush.bf16.msra.mxu1 %v386_v9 }
  0x16   :  { %100 = vmatpush.bf16.msra.mxu0 %v377_v10  ;;  %265 = vmatpush.bf16.msra.mxu2 %v394_v21 }
  0x17   :  { %183 = vmatpush.bf16.msra.mxu1 %v385_v11 }
  0x1a   :  { %101 = vmatpush.bf16.msra.mxu0 %v376_v12  ;;  %266 = vmatpush.bf16.msra.mxu2 %v393_v22 }
  0x1b   :  { %184 = vmatpush.bf16.msra.mxu1 %v384_v15 }
  0x1e   :  { %102 = vmatpush.bf16.msra.mxu0 %v375_v13  ;;  %267 = vmatpush.bf16.msra.mxu2 %v392_v29 }
  0x1f   :  { %185 = vmatpush.bf16.msra.mxu1 %v383_v16 }
  0x21   :  { %103 = vmatmul.bf16.vlgmr.msra.gmra.mxu0 %v26_v14 }
  0x22   :  { %268 = vmatpush.bf16.msra.mxu2 %v391_v30 }
  0x9e   :  { %v104_v24 = vpop.f32.mrf.mxu0 }
  0x9f   :  { %v105_v25 = vadd.f32 %v399_v23, %v104_v24 }
  0xa1   :  { %v108_v26 = vmax.f32 %v105_v25, 0.0 }
  0xa3   :  { %v109_v27 = vpack.c.bf16 %v108_v26, %v108_v26 }
  0xa5   :  { %186 = vmatmul.bf16.vlgmr.msra.gmra.mxu1 %v109_v27 }
  0xa6   :  { %v106_v28 = vpop.f32.mrf.mxu0 }
 0x122   :  { %v187_v32 = vpop.f32.mrf.mxu1 }
 0x123   :  { %v188_v33 = vadd.f32 %v400_v31, %v187_v32 }
 0x125   :  { %v191_v34 = vmax.f32 %v188_v33, 0.0 }
 0x127   :  { %v192_v35 = vpack.c.bf16 %v191_v34, %v191_v34 }
 0x129   :  { %269 = vmatmul.bf16.vlgmr.msra.gmra.mxu2 %v192_v35 }
 0x12a   :  { %v189_v36 = vpop.f32.mrf.mxu1 }
 0x1ac   :  { %v270_v38 = vpop.f32.mrf.mxu2 }
 0x1ad   :  { %v271_v39 = vadd.f32 %v401_v37, %v270_v38 }
 0x1af   :  { %274 = vst [vmem:[%s536_s7] sm:$0xff] %v271_v39 }
 0x1b4   :  { %v272_v40 = vpop.f32.mrf.mxu2 }

</bundles_post_ra>
